<compile_context>
chip_gen: v5e
topology: v5e:2x2
jax: 0.10.0
libtpu: 0.0.40
codegen_flags: <defaults>
</compile_context>

<pallas_src>
import math

import jax
import jax.numpy as jnp
from jax.experimental import pallas as pl
from jax.experimental.pallas import tpu as pltpu

N_EMBD = 32
N_HEAD = 4
HEAD_DIM = N_EMBD // N_HEAD
LN_EPS = 1e-5
NEG_INF = -1e30


def _pick_block_b(B, L, target_rows=64):
    """Pick (bt, nb): batch elements per grid step and number of grid steps.

    Constraints / goals:
      * (bt * L) % 8 == 0  -> legal second-minor block tiling.
      * rows = bt * L around 32-64: keeps the dense (rows, rows) block-diagonal
        softmax waste and the vreg live set small while still amortizing the
        ~0.35us/step grid overhead.
      * prefer >= 2 grid steps when B allows (v7x has 2 TensorCores sharded
        over the "parallel" grid axis).
      * never run the whole batch in a single giant step; B is padded up to
        nb*bt in the wrapper instead (caps VMEM use of the score matrices).
    """
    step = 8 // math.gcd(L, 8)                         # minimal bt so (bt*L) % 8 == 0
    bt = max(step, (target_rows // (step * L)) * step)  # rows <= target (or minimal legal)
    bt = min(bt, -(-B // step) * step)                   # don't over-pad tiny batches
    if bt >= B and B > step:
        # split into at least two grid steps so both v7x cores get work
        half = -(-B // 2)
        bt = max(step, -(-half // step) * step)
    nb = -(-B // bt)
    return bt, nb


def _make_kernel(n_head, n_embd):
    scale = 1.0 / math.sqrt(n_embd)  # module divides by sqrt(D)=sqrt(n_embd)

    def kernel(qkv_ref, w_ref, b_ref, bias_ref, hm_ref, o_ref):
        # qkv_ref : (3, rows, D)  stacked [query, key, value] token slabs.
        # w_ref   : (5, D, D)     [Wq, Wk, Wv, Wp2, Wp] stored (in, out).
        # b_ref   : (7, D)        [bq, bk, bv, bp2, bp, gamma, beta].
        # bias_ref: (rows, rows)  resident block-diagonal additive bias (0 / -1e30).
        # hm_ref  : (n_head, D)   resident per-head 0/1 lane masks.
        gamma = b_ref[5]
        beta = b_ref[6]

        def layernorm(x):
            mean = jnp.mean(x, axis=-1, keepdims=True)
            var = jnp.mean((x - mean) ** 2, axis=-1, keepdims=True)
            return (x - mean) * jax.lax.rsqrt(var + LN_EPS) * gamma + beta

        def resid_proj_ln(i):
            x = qkv_ref[i]
            h = x + jnp.dot(x, w_ref[i], preferred_element_type=jnp.float32) + b_ref[i]
            return layernorm(h)

        q = resid_proj_ln(0) * scale   # fold 1/sqrt(D) into Q once
        k = resid_proj_ln(1)
        v = resid_proj_ln(2)

        attn_bias = bias_ref[...]      # resident; no per-step iota/select rebuild
        hm = hm_ref[...]

        y = jnp.zeros(q.shape, jnp.float32)
        for hd in range(n_head):       # static unroll; (rows,rows) is only a few vregs
            qh = q * hm[hd]            # zero out lanes of other heads
            vh = v * hm[hd]
            s = jax.lax.dot_general(qh, k, (((1,), (1,)), ((), ())),
                                    preferred_element_type=jnp.float32)
            s = s + attn_bias          # restrict attention to the token's own batch element
            s = s - jnp.max(s, axis=-1, keepdims=True)
            p = jnp.exp(s)
            p = p / jnp.sum(p, axis=-1, keepdims=True)   # exact softmax denominator
            y = y + jnp.dot(p, vh, preferred_element_type=jnp.float32)

        # y = relu(proj2(y));  out = LN(proj(y))
        y = jnp.maximum(
            jnp.dot(y, w_ref[3], preferred_element_type=jnp.float32) + b_ref[3], 0.0)
        y = layernorm(
            jnp.dot(y, w_ref[4], preferred_element_type=jnp.float32) + b_ref[4])

        o_ref[...] = y.astype(o_ref.dtype)

    return kernel


def self_attention_forward(query, key, value, params):
    B, L, D = key.shape
    assert D == N_EMBD and query.shape == key.shape == value.shape

    bt, nb = _pick_block_b(B, L)
    rows = bt * L
    Bpad = bt * nb

    # Flat (B*L, D) token slabs; pad the batch up to nb*bt (padded rows are
    # garbage, computed and then discarded — never one giant whole-batch step).
    q2 = query.reshape(B * L, D)
    k2 = key.reshape(B * L, D)
    v2 = value.reshape(B * L, D)
    if Bpad != B:
        pad = ((0, (Bpad - B) * L), (0, 0))
        q2 = jnp.pad(q2, pad)
        k2 = jnp.pad(k2, pad)
        v2 = jnp.pad(v2, pad)
    qkv = jnp.stack([q2, k2, v2])                      # (3, Bpad*L, D) -> one DMA/step

    w_stack = params["w_stack"]                        # (5, D, D)
    b_stack = params["b_stack"]                        # (7, D)

    # Resident extras (constant index_map => DMA'd once, stay in VMEM):
    tok_b = jnp.arange(rows, dtype=jnp.int32) // L
    attn_bias = jnp.where(tok_b[:, None] == tok_b[None, :], 0.0, NEG_INF
                          ).astype(jnp.float32)        # (rows, rows)
    head_mask = (jnp.arange(D, dtype=jnp.int32)[None, :] // HEAD_DIM
                 == jnp.arange(N_HEAD, dtype=jnp.int32)[:, None]
                 ).astype(jnp.float32)                 # (N_HEAD, D)

    out = pl.pallas_call(
        _make_kernel(N_HEAD, N_EMBD),
        out_shape=jax.ShapeDtypeStruct((Bpad * L, D), jnp.float32),
        grid=(nb,),
        in_specs=[
            pl.BlockSpec((3, rows, D), lambda i: (0, i, 0)),
            pl.BlockSpec(w_stack.shape, lambda i: (0, 0, 0)),
            pl.BlockSpec(b_stack.shape, lambda i: (0, 0)),
            pl.BlockSpec((rows, rows), lambda i: (0, 0)),
            pl.BlockSpec(head_mask.shape, lambda i: (0, 0)),
        ],
        out_specs=pl.BlockSpec((rows, D), lambda i: (i, 0)),
        compiler_params=pltpu.CompilerParams(dimension_semantics=("parallel",)),
    )(qkv, w_stack, b_stack, attn_bias, head_mask)
    return out[: B * L].reshape(B, L, D)


def _reference_forward(query, key, value, params):
    """Pure-JAX replica of the PyTorch module forward (validation only)."""
    w = params["w_stack"]
    b = params["b_stack"]
    gamma, beta = b[5], b[6]
    B, L, D = key.shape

    def ln(x):
        m = jnp.mean(x, -1, keepdims=True)
        v = jnp.mean((x - m) ** 2, -1, keepdims=True)
        return (x - m) * jax.lax.rsqrt(v + LN_EPS) * gamma + beta

    Q = ln(query + query @ w[0] + b[0])
    K = ln(key + key @ w[1] + b[1])
    V = ln(value + value @ w[2] + b[2])

    def split(x):
        return x.reshape(B, L, N_HEAD, HEAD_DIM).transpose(0, 2, 1, 3)

    att = jnp.einsum("bhqd,bhkd->bhqk", split(Q), split(K)) / math.sqrt(D)
    att = jax.nn.softmax(att, axis=-1)
    y = jnp.einsum("bhqk,bhkd->bhqd", att, split(V))
    y = y.transpose(0, 2, 1, 3).reshape(B, L, D)
    y = jax.nn.relu(y @ w[3] + b[3])
    return ln(y @ w[4] + b[4])


def init_params(rng_key):
    """Deterministic synthetic init, packed into 2 stacked tensors."""
    keys = jax.random.split(rng_key, 10)
    bound = 1.0 / math.sqrt(N_EMBD)

    def lin_params(kw, kb):
        # stored already transposed: (in, out) so the kernel computes x @ W
        w = jax.random.uniform(kw, (N_EMBD, N_EMBD), jnp.float32, -bound, bound)
        b = jax.random.uniform(kb, (N_EMBD,), jnp.float32, -bound, bound)
        return w, b

    wq, bq = lin_params(keys[0], keys[1])
    wk, bk = lin_params(keys[2], keys[3])
    wv, bv = lin_params(keys[4], keys[5])
    wp2, bp2 = lin_params(keys[6], keys[7])
    wp, bp = lin_params(keys[8], keys[9])
    gamma = jnp.ones((N_EMBD,), jnp.float32)   # nn.LayerNorm default affine
    beta = jnp.zeros((N_EMBD,), jnp.float32)

    return {
        "w_stack": jnp.stack([wq, wk, wv, wp2, wp]),                 # (5, D, D)
        "b_stack": jnp.stack([bq, bk, bv, bp2, bp, gamma, beta]),    # (7, D)
    }


if __name__ == "__main__":
    B, L, D = 2, 8, N_EMBD
    root = jax.random.PRNGKey(0)
    k_q, k_k, k_v, k_p = jax.random.split(root, 4)

    query = jax.random.normal(k_q, (B, L, D), jnp.float32)
    key = jax.random.normal(k_k, (B, L, D), jnp.float32)
    value = jax.random.normal(k_v, (B, L, D), jnp.float32)
    params = init_params(k_p)

    out = jax.block_until_ready(self_attention_forward(query, key, value, params))
    ref = _reference_forward(query, key, value, params)

    assert out.shape == (B, L, D)
    assert jnp.allclose(out, ref, atol=1e-3, rtol=1e-3), (
        "mismatch vs reference, max abs err = %e" % float(jnp.max(jnp.abs(out - ref))))

    print("KERNEL_OK")
</pallas_src>

<mosaic_0001>
module attributes {stable_mosaic.version = 11 : i64} {
  func.func @kernel(%arg0: i32, %arg1: memref<3x8x32xf32, #tpu.memory_space<vmem>>, %arg2: memref<5x32x32xf32, #tpu.memory_space<vmem>>, %arg3: memref<7x32xf32, #tpu.memory_space<vmem>>, %arg4: memref<8x8xf32, #tpu.memory_space<vmem>>, %arg5: memref<4x32xf32, #tpu.memory_space<vmem>>, %arg6: memref<8x32xf32, #tpu.memory_space<vmem>>) attributes {dimension_semantics = [#tpu.dimension_semantics<parallel>], iteration_bounds = array<i64: 2>, scalar_prefetch = 0 : i64, scratch_operands = 0 : i64, tpu.core_type = #tpu.core_type<tc>, window_params = [{transform_indices = @transform_0, window_bounds = array<i64: 3, 8, 32>}, {pipeline_mode = #tpu.pipeline_mode<synchronous>, transform_indices = @transform_1, window_bounds = array<i64: 5, 32, 32>}, {pipeline_mode = #tpu.pipeline_mode<synchronous>, transform_indices = @transform_2, window_bounds = array<i64: 7, 32>}, {pipeline_mode = #tpu.pipeline_mode<synchronous>, transform_indices = @transform_3, window_bounds = array<i64: 8, 8>}, {pipeline_mode = #tpu.pipeline_mode<synchronous>, transform_indices = @transform_4, window_bounds = array<i64: 4, 32>}, {transform_indices = @transform_5, window_bounds = array<i64: 8, 32>}]} {
    %c5 = arith.constant 5 : index
    %c0 = arith.constant 0 : index
    %0 = vector.load %arg3[%c5, %c0] : memref<7x32xf32, #tpu.memory_space<vmem>>, vector<1x32xf32>
    %1 = vector.shape_cast %0 : vector<1x32xf32> to vector<32xf32>
    %c6 = arith.constant 6 : index
    %c0_0 = arith.constant 0 : index
    %2 = vector.load %arg3[%c6, %c0_0] : memref<7x32xf32, #tpu.memory_space<vmem>>, vector<1x32xf32>
    %3 = vector.shape_cast %2 : vector<1x32xf32> to vector<32xf32>
    %c0_1 = arith.constant 0 : index
    %c0_2 = arith.constant 0 : index
    %c0_3 = arith.constant 0 : index
    %4 = vector.load %arg1[%c0_1, %c0_2, %c0_3] : memref<3x8x32xf32, #tpu.memory_space<vmem>>, vector<1x8x32xf32>
    %5 = vector.shape_cast %4 : vector<1x8x32xf32> to vector<8x32xf32>
    %c0_4 = arith.constant 0 : index
    %c0_5 = arith.constant 0 : index
    %c0_6 = arith.constant 0 : index
    %6 = vector.load %arg2[%c0_4, %c0_5, %c0_6] : memref<5x32x32xf32, #tpu.memory_space<vmem>>, vector<1x32x32xf32>
    %7 = vector.shape_cast %6 : vector<1x32x32xf32> to vector<32x32xf32>
    %cst = arith.constant dense<0.000000e+00> : vector<8x32xf32>
    %8 = tpu.matmul %5, %7, %cst {dimension_numbers = #tpu.dot_dimension_numbers<[1], [0], [0], [1], [0, 0, 1, 1], [], []>} : vector<8x32xf32>, vector<32x32xf32>, vector<8x32xf32> -> vector<8x32xf32>
    %9 = arith.addf %5, %8 : vector<8x32xf32>
    %c0_7 = arith.constant 0 : index
    %c0_8 = arith.constant 0 : index
    %10 = vector.load %arg3[%c0_7, %c0_8] : memref<7x32xf32, #tpu.memory_space<vmem>>, vector<1x32xf32>
    %11 = vector.shape_cast %10 : vector<1x32xf32> to vector<32xf32>
    %12 = vector.shape_cast %11 : vector<32xf32> to vector<1x32xf32>
    %13 = vector.broadcast %12 : vector<1x32xf32> to vector<8x32xf32>
    %14 = arith.addf %9, %13 : vector<8x32xf32>
    %cst_9 = arith.constant dense<0.000000e+00> : vector<8xf32>
    %15 = vector.multi_reduction <add>, %14, %cst_9 [1] : vector<8x32xf32> to vector<8xf32>
    %16 = vector.shape_cast %15 : vector<8xf32> to vector<8x1xf32>
    %cst_10 = arith.constant 3.200000e+01 : f32
    %17 = vector.broadcast %cst_10 : f32 to vector<8x1xf32>
    %18 = arith.divf %16, %17 : vector<8x1xf32>
    %19 = vector.broadcast %18 : vector<8x1xf32> to vector<8x32xf32>
    %20 = arith.subf %14, %19 : vector<8x32xf32>
    %21 = arith.mulf %20, %20 : vector<8x32xf32>
    %cst_11 = arith.constant dense<0.000000e+00> : vector<8xf32>
    %22 = vector.multi_reduction <add>, %21, %cst_11 [1] : vector<8x32xf32> to vector<8xf32>
    %23 = vector.shape_cast %22 : vector<8xf32> to vector<8x1xf32>
    %cst_12 = arith.constant 3.200000e+01 : f32
    %24 = vector.broadcast %cst_12 : f32 to vector<8x1xf32>
    %25 = arith.divf %23, %24 : vector<8x1xf32>
    %26 = vector.broadcast %18 : vector<8x1xf32> to vector<8x32xf32>
    %27 = arith.subf %14, %26 : vector<8x32xf32>
    %cst_13 = arith.constant 9.99999974E-6 : f32
    %28 = vector.broadcast %cst_13 : f32 to vector<8x1xf32>
    %29 = arith.addf %25, %28 : vector<8x1xf32>
    %30 = math.rsqrt %29 : vector<8x1xf32>
    %31 = vector.broadcast %30 : vector<8x1xf32> to vector<8x32xf32>
    %32 = arith.mulf %27, %31 : vector<8x32xf32>
    %33 = vector.shape_cast %1 : vector<32xf32> to vector<1x32xf32>
    %34 = vector.broadcast %33 : vector<1x32xf32> to vector<8x32xf32>
    %35 = arith.mulf %32, %34 : vector<8x32xf32>
    %36 = vector.shape_cast %3 : vector<32xf32> to vector<1x32xf32>
    %37 = vector.broadcast %36 : vector<1x32xf32> to vector<8x32xf32>
    %38 = arith.addf %35, %37 : vector<8x32xf32>
    %cst_14 = arith.constant 0.176776692 : f32
    %39 = vector.broadcast %cst_14 : f32 to vector<8x32xf32>
    %40 = arith.mulf %38, %39 : vector<8x32xf32>
    %c1 = arith.constant 1 : index
    %c0_15 = arith.constant 0 : index
    %c0_16 = arith.constant 0 : index
    %41 = vector.load %arg1[%c1, %c0_15, %c0_16] : memref<3x8x32xf32, #tpu.memory_space<vmem>>, vector<1x8x32xf32>
    %42 = vector.shape_cast %41 : vector<1x8x32xf32> to vector<8x32xf32>
    %c1_17 = arith.constant 1 : index
    %c0_18 = arith.constant 0 : index
    %c0_19 = arith.constant 0 : index
    %43 = vector.load %arg2[%c1_17, %c0_18, %c0_19] : memref<5x32x32xf32, #tpu.memory_space<vmem>>, vector<1x32x32xf32>
    %44 = vector.shape_cast %43 : vector<1x32x32xf32> to vector<32x32xf32>
    %cst_20 = arith.constant dense<0.000000e+00> : vector<8x32xf32>
    %45 = tpu.matmul %42, %44, %cst_20 {dimension_numbers = #tpu.dot_dimension_numbers<[1], [0], [0], [1], [0, 0, 1, 1], [], []>} : vector<8x32xf32>, vector<32x32xf32>, vector<8x32xf32> -> vector<8x32xf32>
    %46 = arith.addf %42, %45 : vector<8x32xf32>
    %c1_21 = arith.constant 1 : index
    %c0_22 = arith.constant 0 : index
    %47 = vector.load %arg3[%c1_21, %c0_22] : memref<7x32xf32, #tpu.memory_space<vmem>>, vector<1x32xf32>
    %48 = vector.shape_cast %47 : vector<1x32xf32> to vector<32xf32>
    %49 = vector.shape_cast %48 : vector<32xf32> to vector<1x32xf32>
    %50 = vector.broadcast %49 : vector<1x32xf32> to vector<8x32xf32>
    %51 = arith.addf %46, %50 : vector<8x32xf32>
    %cst_23 = arith.constant dense<0.000000e+00> : vector<8xf32>
    %52 = vector.multi_reduction <add>, %51, %cst_23 [1] : vector<8x32xf32> to vector<8xf32>
    %53 = vector.shape_cast %52 : vector<8xf32> to vector<8x1xf32>
    %cst_24 = arith.constant 3.200000e+01 : f32
    %54 = vector.broadcast %cst_24 : f32 to vector<8x1xf32>
    %55 = arith.divf %53, %54 : vector<8x1xf32>
    %56 = vector.broadcast %55 : vector<8x1xf32> to vector<8x32xf32>
    %57 = arith.subf %51, %56 : vector<8x32xf32>
    %58 = arith.mulf %57, %57 : vector<8x32xf32>
    %cst_25 = arith.constant dense<0.000000e+00> : vector<8xf32>
    %59 = vector.multi_reduction <add>, %58, %cst_25 [1] : vector<8x32xf32> to vector<8xf32>
    %60 = vector.shape_cast %59 : vector<8xf32> to vector<8x1xf32>
    %cst_26 = arith.constant 3.200000e+01 : f32
    %61 = vector.broadcast %cst_26 : f32 to vector<8x1xf32>
    %62 = arith.divf %60, %61 : vector<8x1xf32>
    %63 = vector.broadcast %55 : vector<8x1xf32> to vector<8x32xf32>
    %64 = arith.subf %51, %63 : vector<8x32xf32>
    %cst_27 = arith.constant 9.99999974E-6 : f32
    %65 = vector.broadcast %cst_27 : f32 to vector<8x1xf32>
    %66 = arith.addf %62, %65 : vector<8x1xf32>
    %67 = math.rsqrt %66 : vector<8x1xf32>
    %68 = vector.broadcast %67 : vector<8x1xf32> to vector<8x32xf32>
    %69 = arith.mulf %64, %68 : vector<8x32xf32>
    %70 = vector.shape_cast %1 : vector<32xf32> to vector<1x32xf32>
    %71 = vector.broadcast %70 : vector<1x32xf32> to vector<8x32xf32>
    %72 = arith.mulf %69, %71 : vector<8x32xf32>
    %73 = vector.shape_cast %3 : vector<32xf32> to vector<1x32xf32>
    %74 = vector.broadcast %73 : vector<1x32xf32> to vector<8x32xf32>
    %75 = arith.addf %72, %74 : vector<8x32xf32>
    %c2 = arith.constant 2 : index
    %c0_28 = arith.constant 0 : index
    %c0_29 = arith.constant 0 : index
    %76 = vector.load %arg1[%c2, %c0_28, %c0_29] : memref<3x8x32xf32, #tpu.memory_space<vmem>>, vector<1x8x32xf32>
    %77 = vector.shape_cast %76 : vector<1x8x32xf32> to vector<8x32xf32>
    %c2_30 = arith.constant 2 : index
    %c0_31 = arith.constant 0 : index
    %c0_32 = arith.constant 0 : index
    %78 = vector.load %arg2[%c2_30, %c0_31, %c0_32] : memref<5x32x32xf32, #tpu.memory_space<vmem>>, vector<1x32x32xf32>
    %79 = vector.shape_cast %78 : vector<1x32x32xf32> to vector<32x32xf32>
    %cst_33 = arith.constant dense<0.000000e+00> : vector<8x32xf32>
    %80 = tpu.matmul %77, %79, %cst_33 {dimension_numbers = #tpu.dot_dimension_numbers<[1], [0], [0], [1], [0, 0, 1, 1], [], []>} : vector<8x32xf32>, vector<32x32xf32>, vector<8x32xf32> -> vector<8x32xf32>
    %81 = arith.addf %77, %80 : vector<8x32xf32>
    %c2_34 = arith.constant 2 : index
    %c0_35 = arith.constant 0 : index
    %82 = vector.load %arg3[%c2_34, %c0_35] : memref<7x32xf32, #tpu.memory_space<vmem>>, vector<1x32xf32>
    %83 = vector.shape_cast %82 : vector<1x32xf32> to vector<32xf32>
    %84 = vector.shape_cast %83 : vector<32xf32> to vector<1x32xf32>
    %85 = vector.broadcast %84 : vector<1x32xf32> to vector<8x32xf32>
    %86 = arith.addf %81, %85 : vector<8x32xf32>
    %cst_36 = arith.constant dense<0.000000e+00> : vector<8xf32>
    %87 = vector.multi_reduction <add>, %86, %cst_36 [1] : vector<8x32xf32> to vector<8xf32>
    %88 = vector.shape_cast %87 : vector<8xf32> to vector<8x1xf32>
    %cst_37 = arith.constant 3.200000e+01 : f32
    %89 = vector.broadcast %cst_37 : f32 to vector<8x1xf32>
    %90 = arith.divf %88, %89 : vector<8x1xf32>
    %91 = vector.broadcast %90 : vector<8x1xf32> to vector<8x32xf32>
    %92 = arith.subf %86, %91 : vector<8x32xf32>
    %93 = arith.mulf %92, %92 : vector<8x32xf32>
    %cst_38 = arith.constant dense<0.000000e+00> : vector<8xf32>
    %94 = vector.multi_reduction <add>, %93, %cst_38 [1] : vector<8x32xf32> to vector<8xf32>
    %95 = vector.shape_cast %94 : vector<8xf32> to vector<8x1xf32>
    %cst_39 = arith.constant 3.200000e+01 : f32
    %96 = vector.broadcast %cst_39 : f32 to vector<8x1xf32>
    %97 = arith.divf %95, %96 : vector<8x1xf32>
    %98 = vector.broadcast %90 : vector<8x1xf32> to vector<8x32xf32>
    %99 = arith.subf %86, %98 : vector<8x32xf32>
    %cst_40 = arith.constant 9.99999974E-6 : f32
    %100 = vector.broadcast %cst_40 : f32 to vector<8x1xf32>
    %101 = arith.addf %97, %100 : vector<8x1xf32>
    %102 = math.rsqrt %101 : vector<8x1xf32>
    %103 = vector.broadcast %102 : vector<8x1xf32> to vector<8x32xf32>
    %104 = arith.mulf %99, %103 : vector<8x32xf32>
    %105 = vector.shape_cast %1 : vector<32xf32> to vector<1x32xf32>
    %106 = vector.broadcast %105 : vector<1x32xf32> to vector<8x32xf32>
    %107 = arith.mulf %104, %106 : vector<8x32xf32>
    %108 = vector.shape_cast %3 : vector<32xf32> to vector<1x32xf32>
    %109 = vector.broadcast %108 : vector<1x32xf32> to vector<8x32xf32>
    %110 = arith.addf %107, %109 : vector<8x32xf32>
    %c0_41 = arith.constant 0 : index
    %c0_42 = arith.constant 0 : index
    %111 = vector.load %arg4[%c0_41, %c0_42] : memref<8x8xf32, #tpu.memory_space<vmem>>, vector<8x8xf32>
    %c0_43 = arith.constant 0 : index
    %c0_44 = arith.constant 0 : index
    %112 = vector.load %arg5[%c0_43, %c0_44] : memref<4x32xf32, #tpu.memory_space<vmem>>, vector<4x32xf32>
    %cst_45 = arith.constant 0.000000e+00 : f32
    %113 = vector.broadcast %cst_45 : f32 to vector<8x32xf32>
    %114 = vector.extract_strided_slice %112 {offsets = [0, 0], sizes = [1, 32], strides = [1, 1]} : vector<4x32xf32> to vector<1x32xf32>
    %115 = vector.shape_cast %114 : vector<1x32xf32> to vector<32xf32>
    %116 = vector.shape_cast %115 : vector<32xf32> to vector<1x32xf32>
    %117 = vector.broadcast %116 : vector<1x32xf32> to vector<8x32xf32>
    %118 = arith.mulf %40, %117 : vector<8x32xf32>
    %119 = vector.extract_strided_slice %112 {offsets = [0, 0], sizes = [1, 32], strides = [1, 1]} : vector<4x32xf32> to vector<1x32xf32>
    %120 = vector.shape_cast %119 : vector<1x32xf32> to vector<32xf32>
    %121 = vector.shape_cast %120 : vector<32xf32> to vector<1x32xf32>
    %122 = vector.broadcast %121 : vector<1x32xf32> to vector<8x32xf32>
    %123 = arith.mulf %110, %122 : vector<8x32xf32>
    %cst_46 = arith.constant dense<0.000000e+00> : vector<8x8xf32>
    %124 = tpu.matmul %118, %75, %cst_46 {dimension_numbers = #tpu.dot_dimension_numbers<[1], [1], [0], [0], [0, 0, 1, 0], [], []>} : vector<8x32xf32>, vector<8x32xf32>, vector<8x8xf32> -> vector<8x8xf32>
    %125 = arith.addf %124, %111 : vector<8x8xf32>
    %cst_47 = arith.constant dense<0xFF800000> : vector<8xf32>
    %126 = vector.multi_reduction <maximumf>, %125, %cst_47 [1] : vector<8x8xf32> to vector<8xf32>
    %127 = vector.shape_cast %126 : vector<8xf32> to vector<8x1xf32>
    %128 = vector.broadcast %127 : vector<8x1xf32> to vector<8x8xf32>
    %129 = arith.subf %125, %128 : vector<8x8xf32>
    %130 = math.exp %129 : vector<8x8xf32>
    %cst_48 = arith.constant dense<0.000000e+00> : vector<8xf32>
    %131 = vector.multi_reduction <add>, %130, %cst_48 [1] : vector<8x8xf32> to vector<8xf32>
    %132 = vector.shape_cast %131 : vector<8xf32> to vector<8x1xf32>
    %133 = vector.broadcast %132 : vector<8x1xf32> to vector<8x8xf32>
    %134 = arith.divf %130, %133 : vector<8x8xf32>
    %cst_49 = arith.constant dense<0.000000e+00> : vector<8x32xf32>
    %135 = tpu.matmul %134, %123, %cst_49 {dimension_numbers = #tpu.dot_dimension_numbers<[1], [0], [0], [1], [0, 0, 1, 1], [], []>} : vector<8x8xf32>, vector<8x32xf32>, vector<8x32xf32> -> vector<8x32xf32>
    %136 = arith.addf %113, %135 : vector<8x32xf32>
    %137 = vector.extract_strided_slice %112 {offsets = [1, 0], sizes = [1, 32], strides = [1, 1]} : vector<4x32xf32> to vector<1x32xf32>
    %138 = vector.shape_cast %137 : vector<1x32xf32> to vector<32xf32>
    %139 = vector.shape_cast %138 : vector<32xf32> to vector<1x32xf32>
    %140 = vector.broadcast %139 : vector<1x32xf32> to vector<8x32xf32>
    %141 = arith.mulf %40, %140 : vector<8x32xf32>
    %142 = vector.extract_strided_slice %112 {offsets = [1, 0], sizes = [1, 32], strides = [1, 1]} : vector<4x32xf32> to vector<1x32xf32>
    %143 = vector.shape_cast %142 : vector<1x32xf32> to vector<32xf32>
    %144 = vector.shape_cast %143 : vector<32xf32> to vector<1x32xf32>
    %145 = vector.broadcast %144 : vector<1x32xf32> to vector<8x32xf32>
    %146 = arith.mulf %110, %145 : vector<8x32xf32>
    %cst_50 = arith.constant dense<0.000000e+00> : vector<8x8xf32>
    %147 = tpu.matmul %141, %75, %cst_50 {dimension_numbers = #tpu.dot_dimension_numbers<[1], [1], [0], [0], [0, 0, 1, 0], [], []>} : vector<8x32xf32>, vector<8x32xf32>, vector<8x8xf32> -> vector<8x8xf32>
    %148 = arith.addf %147, %111 : vector<8x8xf32>
    %cst_51 = arith.constant dense<0xFF800000> : vector<8xf32>
    %149 = vector.multi_reduction <maximumf>, %148, %cst_51 [1] : vector<8x8xf32> to vector<8xf32>
    %150 = vector.shape_cast %149 : vector<8xf32> to vector<8x1xf32>
    %151 = vector.broadcast %150 : vector<8x1xf32> to vector<8x8xf32>
    %152 = arith.subf %148, %151 : vector<8x8xf32>
    %153 = math.exp %152 : vector<8x8xf32>
    %cst_52 = arith.constant dense<0.000000e+00> : vector<8xf32>
    %154 = vector.multi_reduction <add>, %153, %cst_52 [1] : vector<8x8xf32> to vector<8xf32>
    %155 = vector.shape_cast %154 : vector<8xf32> to vector<8x1xf32>
    %156 = vector.broadcast %155 : vector<8x1xf32> to vector<8x8xf32>
    %157 = arith.divf %153, %156 : vector<8x8xf32>
    %cst_53 = arith.constant dense<0.000000e+00> : vector<8x32xf32>
    %158 = tpu.matmul %157, %146, %cst_53 {dimension_numbers = #tpu.dot_dimension_numbers<[1], [0], [0], [1], [0, 0, 1, 1], [], []>} : vector<8x8xf32>, vector<8x32xf32>, vector<8x32xf32> -> vector<8x32xf32>
    %159 = arith.addf %136, %158 : vector<8x32xf32>
    %160 = vector.extract_strided_slice %112 {offsets = [2, 0], sizes = [1, 32], strides = [1, 1]} : vector<4x32xf32> to vector<1x32xf32>
    %161 = vector.shape_cast %160 : vector<1x32xf32> to vector<32xf32>
    %162 = vector.shape_cast %161 : vector<32xf32> to vector<1x32xf32>
    %163 = vector.broadcast %162 : vector<1x32xf32> to vector<8x32xf32>
    %164 = arith.mulf %40, %163 : vector<8x32xf32>
    %165 = vector.extract_strided_slice %112 {offsets = [2, 0], sizes = [1, 32], strides = [1, 1]} : vector<4x32xf32> to vector<1x32xf32>
    %166 = vector.shape_cast %165 : vector<1x32xf32> to vector<32xf32>
    %167 = vector.shape_cast %166 : vector<32xf32> to vector<1x32xf32>
    %168 = vector.broadcast %167 : vector<1x32xf32> to vector<8x32xf32>
    %169 = arith.mulf %110, %168 : vector<8x32xf32>
    %cst_54 = arith.constant dense<0.000000e+00> : vector<8x8xf32>
    %170 = tpu.matmul %164, %75, %cst_54 {dimension_numbers = #tpu.dot_dimension_numbers<[1], [1], [0], [0], [0, 0, 1, 0], [], []>} : vector<8x32xf32>, vector<8x32xf32>, vector<8x8xf32> -> vector<8x8xf32>
    %171 = arith.addf %170, %111 : vector<8x8xf32>
    %cst_55 = arith.constant dense<0xFF800000> : vector<8xf32>
    %172 = vector.multi_reduction <maximumf>, %171, %cst_55 [1] : vector<8x8xf32> to vector<8xf32>
    %173 = vector.shape_cast %172 : vector<8xf32> to vector<8x1xf32>
    %174 = vector.broadcast %173 : vector<8x1xf32> to vector<8x8xf32>
    %175 = arith.subf %171, %174 : vector<8x8xf32>
    %176 = math.exp %175 : vector<8x8xf32>
    %cst_56 = arith.constant dense<0.000000e+00> : vector<8xf32>
    %177 = vector.multi_reduction <add>, %176, %cst_56 [1] : vector<8x8xf32> to vector<8xf32>
    %178 = vector.shape_cast %177 : vector<8xf32> to vector<8x1xf32>
    %179 = vector.broadcast %178 : vector<8x1xf32> to vector<8x8xf32>
    %180 = arith.divf %176, %179 : vector<8x8xf32>
    %cst_57 = arith.constant dense<0.000000e+00> : vector<8x32xf32>
    %181 = tpu.matmul %180, %169, %cst_57 {dimension_numbers = #tpu.dot_dimension_numbers<[1], [0], [0], [1], [0, 0, 1, 1], [], []>} : vector<8x8xf32>, vector<8x32xf32>, vector<8x32xf32> -> vector<8x32xf32>
    %182 = arith.addf %159, %181 : vector<8x32xf32>
    %183 = vector.extract_strided_slice %112 {offsets = [3, 0], sizes = [1, 32], strides = [1, 1]} : vector<4x32xf32> to vector<1x32xf32>
    %184 = vector.shape_cast %183 : vector<1x32xf32> to vector<32xf32>
    %185 = vector.shape_cast %184 : vector<32xf32> to vector<1x32xf32>
    %186 = vector.broadcast %185 : vector<1x32xf32> to vector<8x32xf32>
    %187 = arith.mulf %40, %186 : vector<8x32xf32>
    %188 = vector.extract_strided_slice %112 {offsets = [3, 0], sizes = [1, 32], strides = [1, 1]} : vector<4x32xf32> to vector<1x32xf32>
    %189 = vector.shape_cast %188 : vector<1x32xf32> to vector<32xf32>
    %190 = vector.shape_cast %189 : vector<32xf32> to vector<1x32xf32>
    %191 = vector.broadcast %190 : vector<1x32xf32> to vector<8x32xf32>
    %192 = arith.mulf %110, %191 : vector<8x32xf32>
    %cst_58 = arith.constant dense<0.000000e+00> : vector<8x8xf32>
    %193 = tpu.matmul %187, %75, %cst_58 {dimension_numbers = #tpu.dot_dimension_numbers<[1], [1], [0], [0], [0, 0, 1, 0], [], []>} : vector<8x32xf32>, vector<8x32xf32>, vector<8x8xf32> -> vector<8x8xf32>
    %194 = arith.addf %193, %111 : vector<8x8xf32>
    %cst_59 = arith.constant dense<0xFF800000> : vector<8xf32>
    %195 = vector.multi_reduction <maximumf>, %194, %cst_59 [1] : vector<8x8xf32> to vector<8xf32>
    %196 = vector.shape_cast %195 : vector<8xf32> to vector<8x1xf32>
    %197 = vector.broadcast %196 : vector<8x1xf32> to vector<8x8xf32>
    %198 = arith.subf %194, %197 : vector<8x8xf32>
    %199 = math.exp %198 : vector<8x8xf32>
    %cst_60 = arith.constant dense<0.000000e+00> : vector<8xf32>
    %200 = vector.multi_reduction <add>, %199, %cst_60 [1] : vector<8x8xf32> to vector<8xf32>
    %201 = vector.shape_cast %200 : vector<8xf32> to vector<8x1xf32>
    %202 = vector.broadcast %201 : vector<8x1xf32> to vector<8x8xf32>
    %203 = arith.divf %199, %202 : vector<8x8xf32>
    %cst_61 = arith.constant dense<0.000000e+00> : vector<8x32xf32>
    %204 = tpu.matmul %203, %192, %cst_61 {dimension_numbers = #tpu.dot_dimension_numbers<[1], [0], [0], [1], [0, 0, 1, 1], [], []>} : vector<8x8xf32>, vector<8x32xf32>, vector<8x32xf32> -> vector<8x32xf32>
    %205 = arith.addf %182, %204 : vector<8x32xf32>
    %c3 = arith.constant 3 : index
    %c0_62 = arith.constant 0 : index
    %c0_63 = arith.constant 0 : index
    %206 = vector.load %arg2[%c3, %c0_62, %c0_63] : memref<5x32x32xf32, #tpu.memory_space<vmem>>, vector<1x32x32xf32>
    %207 = vector.shape_cast %206 : vector<1x32x32xf32> to vector<32x32xf32>
    %cst_64 = arith.constant dense<0.000000e+00> : vector<8x32xf32>
    %208 = tpu.matmul %205, %207, %cst_64 {dimension_numbers = #tpu.dot_dimension_numbers<[1], [0], [0], [1], [0, 0, 1, 1], [], []>} : vector<8x32xf32>, vector<32x32xf32>, vector<8x32xf32> -> vector<8x32xf32>
    %c3_65 = arith.constant 3 : index
    %c0_66 = arith.constant 0 : index
    %209 = vector.load %arg3[%c3_65, %c0_66] : memref<7x32xf32, #tpu.memory_space<vmem>>, vector<1x32xf32>
    %210 = vector.shape_cast %209 : vector<1x32xf32> to vector<32xf32>
    %211 = vector.shape_cast %210 : vector<32xf32> to vector<1x32xf32>
    %212 = vector.broadcast %211 : vector<1x32xf32> to vector<8x32xf32>
    %213 = arith.addf %208, %212 : vector<8x32xf32>
    %cst_67 = arith.constant 0.000000e+00 : f32
    %214 = vector.broadcast %cst_67 : f32 to vector<8x32xf32>
    %215 = arith.maximumf %213, %214 : vector<8x32xf32>
    %c4 = arith.constant 4 : index
    %c0_68 = arith.constant 0 : index
    %c0_69 = arith.constant 0 : index
    %216 = vector.load %arg2[%c4, %c0_68, %c0_69] : memref<5x32x32xf32, #tpu.memory_space<vmem>>, vector<1x32x32xf32>
    %217 = vector.shape_cast %216 : vector<1x32x32xf32> to vector<32x32xf32>
    %cst_70 = arith.constant dense<0.000000e+00> : vector<8x32xf32>
    %218 = tpu.matmul %215, %217, %cst_70 {dimension_numbers = #tpu.dot_dimension_numbers<[1], [0], [0], [1], [0, 0, 1, 1], [], []>} : vector<8x32xf32>, vector<32x32xf32>, vector<8x32xf32> -> vector<8x32xf32>
    %c4_71 = arith.constant 4 : index
    %c0_72 = arith.constant 0 : index
    %219 = vector.load %arg3[%c4_71, %c0_72] : memref<7x32xf32, #tpu.memory_space<vmem>>, vector<1x32xf32>
    %220 = vector.shape_cast %219 : vector<1x32xf32> to vector<32xf32>
    %221 = vector.shape_cast %220 : vector<32xf32> to vector<1x32xf32>
    %222 = vector.broadcast %221 : vector<1x32xf32> to vector<8x32xf32>
    %223 = arith.addf %218, %222 : vector<8x32xf32>
    %cst_73 = arith.constant dense<0.000000e+00> : vector<8xf32>
    %224 = vector.multi_reduction <add>, %223, %cst_73 [1] : vector<8x32xf32> to vector<8xf32>
    %225 = vector.shape_cast %224 : vector<8xf32> to vector<8x1xf32>
    %cst_74 = arith.constant 3.200000e+01 : f32
    %226 = vector.broadcast %cst_74 : f32 to vector<8x1xf32>
    %227 = arith.divf %225, %226 : vector<8x1xf32>
    %228 = vector.broadcast %227 : vector<8x1xf32> to vector<8x32xf32>
    %229 = arith.subf %223, %228 : vector<8x32xf32>
    %230 = arith.mulf %229, %229 : vector<8x32xf32>
    %cst_75 = arith.constant dense<0.000000e+00> : vector<8xf32>
    %231 = vector.multi_reduction <add>, %230, %cst_75 [1] : vector<8x32xf32> to vector<8xf32>
    %232 = vector.shape_cast %231 : vector<8xf32> to vector<8x1xf32>
    %cst_76 = arith.constant 3.200000e+01 : f32
    %233 = vector.broadcast %cst_76 : f32 to vector<8x1xf32>
    %234 = arith.divf %232, %233 : vector<8x1xf32>
    %235 = vector.broadcast %227 : vector<8x1xf32> to vector<8x32xf32>
    %236 = arith.subf %223, %235 : vector<8x32xf32>
    %cst_77 = arith.constant 9.99999974E-6 : f32
    %237 = vector.broadcast %cst_77 : f32 to vector<8x1xf32>
    %238 = arith.addf %234, %237 : vector<8x1xf32>
    %239 = math.rsqrt %238 : vector<8x1xf32>
    %240 = vector.broadcast %239 : vector<8x1xf32> to vector<8x32xf32>
    %241 = arith.mulf %236, %240 : vector<8x32xf32>
    %242 = vector.shape_cast %1 : vector<32xf32> to vector<1x32xf32>
    %243 = vector.broadcast %242 : vector<1x32xf32> to vector<8x32xf32>
    %244 = arith.mulf %241, %243 : vector<8x32xf32>
    %245 = vector.shape_cast %3 : vector<32xf32> to vector<1x32xf32>
    %246 = vector.broadcast %245 : vector<1x32xf32> to vector<8x32xf32>
    %247 = arith.addf %244, %246 : vector<8x32xf32>
    %c0_78 = arith.constant 0 : index
    %c0_79 = arith.constant 0 : index
    %248 = vector.load %arg6[%c0_78, %c0_79] : memref<8x32xf32, #tpu.memory_space<vmem>>, vector<8x32xf32>
    tpu.vector_store %arg6[%c0_78, %c0_79], %247 {strides = array<i32>} : memref<8x32xf32, #tpu.memory_space<vmem>>, vector<8x32xf32>,
    return
  }
  func.func @transform_0(%arg0: i32) -> (i32, i32, i32) {
    %c0_i32 = arith.constant 0 : i32
    %c0_i32_0 = arith.constant 0 : i32
    %c0_i32_1 = arith.constant 0 : i32
    return %c0_i32, %arg0, %c0_i32_0 : i32, i32, i32
  }
  func.func @transform_1(%arg0: i32) -> (i32, i32, i32) {
    %c0_i32 = arith.constant 0 : i32
    %c0_i32_0 = arith.constant 0 : i32
    %c0_i32_1 = arith.constant 0 : i32
    %c0_i32_2 = arith.constant 0 : i32
    return %c0_i32, %c0_i32_0, %c0_i32_1 : i32, i32, i32
  }
  func.func @transform_2(%arg0: i32) -> (i32, i32) {
    %c0_i32 = arith.constant 0 : i32
    %c0_i32_0 = arith.constant 0 : i32
    %c0_i32_1 = arith.constant 0 : i32
    return %c0_i32, %c0_i32_0 : i32, i32
  }
  func.func @transform_3(%arg0: i32) -> (i32, i32) {
    %c0_i32 = arith.constant 0 : i32
    %c0_i32_0 = arith.constant 0 : i32
    %c0_i32_1 = arith.constant 0 : i32
    return %c0_i32, %c0_i32_0 : i32, i32
  }
  func.func @transform_4(%arg0: i32) -> (i32, i32) {
    %c0_i32 = arith.constant 0 : i32
    %c0_i32_0 = arith.constant 0 : i32
    %c0_i32_1 = arith.constant 0 : i32
    return %c0_i32, %c0_i32_0 : i32, i32
  }
  func.func @transform_5(%arg0: i32) -> (i32, i32) {
    %c0_i32 = arith.constant 0 : i32
    %c0_i32_0 = arith.constant 0 : i32
    return %arg0, %c0_i32 : i32, i32
  }
}

</mosaic_0001>

<bundles_post_ra>
// kernel: tpu_custom_call.1
= control target key start
LH: loop header
LB: loop body
LE: loop exit
PB: predicated region body
PF: predicated region fallthrough
CT: control target
= control target key end

     0   :  { %s1678_s0 = inlined_call_operand.hbm [shape: f32[3,16,32], index: 0, kind: input, shape index: {}]   ;;  %s1679_s1 = inlined_call_operand.hbm [shape: f32[5,32,32], index: 1, kind: input, shape index: {}]   ;;  %s1680_s2 = inlined_call_operand.hbm [shape: f32[7,32], index: 2, kind: input, shape index: {}]   ;;  %s1681_s3 = inlined_call_operand.hbm [shape: f32[8,8], index: 3, kind: input, shape index: {}]   ;;  %s1682_s4 = inlined_call_operand.hbm [shape: f32[4,32], index: 4, kind: input, shape index: {}]   ;;  %s1683_s5 = inlined_call_operand.hbm [shape: f32[16,32], index: 5, kind: output, shape index: {}]  }
   0x1   :  { %1686 = sst [smem:[#allocation16_spill]] %s1679_s1 }
   0x2   :  { %10 = vsyncpa [#allocation3], 0 }
   0x3   :  { %12 = vsyncpa [#allocation3 + $0x1], 0 }
   0x4   :  { %13 = vsyncpa [#allocation6], 0 }
   0x5   :  { %14 = vsyncpa [#allocation9], 0 }
   0x6   :  { %15 = vsyncpa [#allocation4], 0 }
   0x7   :  { %17 = vsyncpa [#allocation4 + $0x1], 0  ;;  %s1426_s18 = smov 0   ;;  %s1428_s19 = smov 0  }
   0x8   :  { %s1430_s20 = smov 0   ;;  %s1432_s21 = smov 0  }
   0x9 LB: > { %s1447_s22 = sadd.s32 4294967295, %s1386_s21   ;;  %s999_s23 = sadd.s32 4294967294, %s1386_s21   ;;  %s1386_s21 = sphi %s1432_s21, %s1700_s21   ;;  %s1382_s20 = sphi %s1430_s20, %s1699_s20   ;;  %s1378_s19 = sphi %s1428_s19, %s1698_s19   ;;  %s1374_s18 = sphi %s1426_s18, %s1697_s18  }
   0xa   : > { %p43_p0 = scmp.ne.s32.totalorder %s1378_s19, %s1374_s18  ;;  %p44_p1 = scmp.eq.s32.totalorder %s1447_s22, 0 }
   0xb   : > { %p151_p2 = scmp.eq.s32.totalorder %s1447_s22, 1  ;;  %p157_p3 = scmp.eq.s32.totalorder %s999_s23, 1 }
   0xc   : > { %p1456_p4 = por %p44_p1, %p43_p0  ;;  %p1000_p5 = scmp.ge.s32.totalorder %s1386_s21, 1 }
   0xd   : > { %p1461_p6 = por %p157_p3, %p43_p0  ;;  %p164_p7 = scmp.lt.s32.totalorder %s1386_s21, 3 }
   0xe   : > { %s1689_s1 = sld [smem:[#allocation16_spill]]  ;;  %s1388_s30 = smov [#allocation5]  }
   0xf   : > { %p1469_p8 = pnand %p1000_p5, %p164_p7  ;;  %s177_s6 = sshll.u32 %s1388_s30, 4  ;;  %s178_s6 = int_to_ptr.vmem [resolvable:$true] %s177_s6 }
  0x10   : > { %s202_s10 = sshll.u32 %s1681_s3, 4  ;;  %s1684_s11 = smov 128   ;;  %s203_s10 = int_to_ptr.hbm [resolvable:$true] %s202_s10 }
  0x11   : > { %p1058_p9 = pneg %p1469_p8  ;;  %s1685_s12 = smov 8  }
  0x12   : > { %s1391_s13 = smov [#allocation8]   ;;  %s190_s17 = sshll.u32 %s1680_s2, 4  ;;  %s191_s17 = int_to_ptr.hbm [resolvable:$true] %s190_s17 }
  0x13   : > { %p1477_p10 = pnand %p1058_p9, %p44_p1  ;;  %s204_s14 = sshll.u32 %s1391_s13, 4  ;;  %s205_s14 = int_to_ptr.vmem [resolvable:$true] %s204_s14 }
  0x14   : > { %s175_s28 = sshll.u32 %s1689_s1, 4  ;;  %s214_s27 = sshll.u32 %s1682_s4, 4  ;;  %s176_s28 = int_to_ptr.hbm [resolvable:$true] %s175_s28  ;;  %s215_s27 = int_to_ptr.hbm [resolvable:$true] %s214_s27 }
  0x15   : > { %1061 = dma.hbm_to_vmem [thread:$0]  (!%p1477_p10), %s176_s28, 2560, %s178_s6, [#allocation6], %s1684_s11, %s1684_s11, %s1685_s12  }
  0x16   : > { %1067 = dma.hbm_to_vmem [thread:$0]  (!%p1477_p10), %s203_s10, 128, %s205_s14, [#allocation9]  }
  0x17   : > { %s1392_s28 = smov [#allocation7]   ;;  %s1393_s6 = smov [#allocation10]  }
  0x18   : > { %s192_s30 = sshll.u32 %s1392_s28, 4  ;;  %s216_s8 = sshll.u32 %s1393_s6, 4  ;;  %s193_s30 = int_to_ptr.vmem [resolvable:$true] %s192_s30  ;;  %s217_s8 = int_to_ptr.vmem [resolvable:$true] %s216_s8 }
  0x19   : > { %1064 = dma.hbm_to_vmem [thread:$0]  (!%p1477_p10), %s191_s17, 128, %s193_s30, [#allocation6]  }
  0x1a   : > { %1070 = dma.hbm_to_vmem [thread:$0]  (!%p1477_p10), %s215_s27, 64, %s217_s8, [#allocation9]  }
  0x1b   : > { %s1503_s9 = sadd.s32 1, %s1386_s21   ;;  %s30_s10 = sadd.s32 1, %s1382_s20 }
  0x1c   : > { %s27_s13 = ssub.s32 %s1386_s21, %s1503_s9  ;;  %p37_p12 = scmp.ne.s32.totalorder %s1382_s20, %s1378_s19 }
  0x1d   : > { %p28_p13 = scmp.eq.s32.totalorder %s27_s13, 0  ;;  %p38_p0 = scmp.eq.s32.totalorder %s1386_s21, 0 }
  0x1e   : > { %p1513_p3 = por %p151_p2, %p37_p12  ;;  %p1083_p5 = scmp.lt.s32.totalorder %s1386_s21, 2 }
  0x1f   : > { %s1519_s15 = scalar_select %p28_p13, %s1382_s20, %s30_s10  }
  0x20   : > { %p39_p7 = por %p38_p0, %p37_p12  ;;  %s227_s16 = sand.u32 1, %s1382_s20  }
  0x21   : > { %s1036_s7 = smul.u32 24, %s227_s16  ;;  %s1006_s17 = sshll.u32 %s1386_s21, 3 }
  0x22   : > { %p1523_p9 = pnand %p1083_p5, %p39_p7  ;;  %s235_s28 = scalar_lea.hbm %s1678_s0, %s1006_s17 }
  0x23   : > { %s236_s30 = sshll.u32 %s235_s28, 4  ;;  %s231_s6 = scalar_lea.vmem [#allocation2], %s1036_s7  ;;  %s237_s30 = int_to_ptr.hbm [resolvable:$true] %s236_s30 }
  0x24   : > { %s238_s8 = sshll.u32 %s231_s6, 4  ;;  %s228_s10 = scalar_lea.sflag [#allocation3], %s227_s16  ;;  %s239_s8 = int_to_ptr.vmem [resolvable:$true] %s238_s8 }
  0x25   : > { %s1282_s13 = sshra.s32 %s237_s30, 4  ;;  %p1286_p10 = pneg %p1523_p9  ;;  %s1283_s13 = int_to_ptr.hbm [resolvable:$true] %s1282_s13 }
  0x26   : > { %s1284_s11 = scalar_lea.hbm %s1283_s13, 24  ;;  %s1289_s26 = scalar_lea.hbm %s1678_s0, 48 }
  0x27   : > { %p1285_p2 = scmp.ne.s32.totalorder %s1283_s13, %s1284_s11  ;;  %p1290_p0 = scmp.lt.s32.totalorder %s1283_s13, %s1678_s0 }
  0x28   : > { %p1291_p5 = scmp.lt.s32.totalorder %s1289_s26, %s1284_s11 }
  0x29   : > { %p1287_p12 = pnand %p1286_p10, %p1285_p2 }
  0x2a   : > { %p1292_p7 = por %p1291_p5, %p1290_p0 }
  0x2b   : > { %p1288_p13 = pneg %p1287_p12 }
  0x2d   : > { %p1293_p11 = pnand %p1292_p7, %p1288_p13 }
  0x2f   : > { %1296 = shalt.err (!%p1293_p11)
}
  0x30   : > { %s1394_s16 = smov 256   ;;  %s1694_s7 = smov 8  }
  0x31   : > { %s1695_s28 = smov 128   ;;  %250 = sbr.rel (%p1469_p8) target bundleno = 1952 (0x7a0), region = 40 }
  0x32   : > { %1074 = dma.hbm_to_vmem [thread:$0]  (!%p1523_p9), %s237_s30, 384, %s239_s8, %s228_s10, %s1394_s16, %s1695_s28, %s1694_s7  }
  0x33   : > { %s1545_s1 = sand.u32 (!%p1469_p8), 1, %s1378_s19  }
  0x34   : > { %s1037_s12 = smul.u32 (!%p1469_p8), 24, %s1545_s1  ;;  %s253_s11 = scalar_lea.sflag (!%p1469_p8), [#allocation3], %s1545_s1 }
  0x36   : > { %s1549_s6 = scalar_lea.vmem [#allocation2], %s1037_s12 }
  0x37   : > { %1357 = dma.done.wait (%p1456_p4), %s253_s11, 384  }
  0x38   : > { %1359 = vsyncadd (%p1456_p4), %s253_s11, 4294966912 }
  0x39   : > { %1361 = dma.done.wait (%p44_p1), [#allocation6], 2688  }
  0x3a   : > { %1363 = vsyncadd (%p44_p1), [#allocation6], 4294964608 }
  0x3b   : > { %1365 = dma.done.wait (%p44_p1), [#allocation9], 192  }
  0x3c   : > { %1367 = vsyncadd (%p44_p1), [#allocation9], 4294967104  ;;  %v310_v0 = vld [vmem:[#allocation5 + $0x18] sm:$0xff]  ;;  %v309_v2 = vld [vmem:[#allocation5 + $0x10] sm:$0xff]  ;;  %vm311_vm0 = vcmask 261120   ;;  %v1395_v30 = vmov 32.0  }
  0x3d   : > { %v437_v1 = vld [vmem:[#allocation5 + $0x58] sm:$0xff]  ;;  %327 = vmatpush.msra.mxu0 %v310_v0  ;;  %v436_v3 = vld [vmem:[#allocation5 + $0x50] sm:$0xff]  ;;  %v308_v4 = vld [vmem:[#allocation5 + $0x8] sm:$0xff]  ;;  %1136 = vrcp.f32 %v1395_v30  ;;  %vm520_vm11 = vcmask 64512   ;;  %s1012_s24 = sshll.u32 %s1545_s1, 3  ;;  %s1033_s29 = sshll.u32 %s1447_s22, 3 }
  0x3e   : > { %453 = vmatpush.msra.mxu2 %v437_v1  ;;  %v435_v5 = vld [vmem:[#allocation5 + $0x48] sm:$0xff]  ;;  %v307_v6 = vld [vmem:[#allocation5] sm:$0xff]  ;;  %v379_v8 = vld [vmem:[#allocation5 + $0x38] sm:$0xff]  ;;  %s886_s8 = scalar_lea.hbm %s1683_s5, %s1033_s29  ;;  %s303_s10 = scalar_lea.vmem [#allocation11], %s1012_s24 }
  0x3f   : > { %328 = vmatpush.msra.mxu0 %v309_v2  ;;  %v434_v7 = vld [vmem:[#allocation5 + $0x40] sm:$0xff]  ;;  %v378_v9 = vld [vmem:[#allocation5 + $0x30] sm:$0xff]  ;;  %395 = vmatpush.msra.mxu1 %v379_v8  ;;  %v377_v12 = vld [vmem:[#allocation5 + $0x28] sm:$0xff]  ;;  %s888_s13 = sshll.u32 %s303_s10, 4  ;;  %s890_s26 = sshll.u32 %s886_s8, 4  ;;  %s889_s13 = int_to_ptr.vmem [resolvable:$true] %s888_s13  ;;  %s891_s26 = int_to_ptr.hbm [resolvable:$true] %s890_s26 }
  0x40   : > { %454 = vmatpush.msra.mxu2 %v436_v3  ;;  %v306_v10 = vld [vmem:[%s1549_s6] sm:$0xff]  ;;  %v1016_v11 = vld [vmem:[%s1549_s6 + $0x10] sm:$0xff]  ;;  %v1014_v14 = vld [vmem:[%s1549_s6 + $0x8] sm:$0xff]  ;;  %s876_s22 = scalar_lea.sflag [#allocation4], %s1545_s1  ;;  %s1326_s27 = sshra.s32 %s891_s26, 4  ;;  %s1327_s27 = int_to_ptr.hbm [resolvable:$true] %s1326_s27 }
  0x41   : > { %329 = vmatpush.msra.mxu0 %v308_v4  ;;  %396 = vmatpush.msra.mxu1 %v378_v9  ;;  %v376_v13 = vld [vmem:[#allocation5 + $0x20] sm:$0xff]  ;;  %s1328_s17 = scalar_lea.hbm %s1327_s27, 8  ;;  %s1332_s28 = scalar_lea.hbm %s1683_s5, 16 }
  0x42   : > { %455 = vmatpush.msra.mxu2 %v435_v5  ;;  %v1129_v15 = vld [vmem:[#allocation7] ss:$0 sm:$0xff]  ;;  %v1131_v19 = vld [vmem:[#allocation7 + $0x1] ss:$0 sm:$0xff]  ;;  %v1130_v23 = vld [vmem:[#allocation7 + $0x2] ss:$0 sm:$0xff]  ;;  %p1329_p1 = scmp.ne.s32.totalorder %s1327_s27, %s1328_s17  ;;  %p1333_p11 = scmp.lt.s32.totalorder %s1327_s27, %s1683_s5 }
  0x43   : > { %330 = vmatpush.msra.mxu0 %v307_v6  ;;  %397 = vmatpush.msra.mxu1 %v377_v12  ;;  %v1137_v31 = vpop.eup %1136  ;;  %v1583_v9 = vld [vmem:[#allocation7 + $0x5] ss:$0 sm:$0xff]  ;;  %p1334_p9 = scmp.lt.s32.totalorder %s1332_s28, %s1328_s17 }
  0x44   : > { %456 = vmatpush.msra.mxu2 %v434_v7  ;;  %1013 = vmatmul.msk.f32.vlgmr.msra.gmra.mxu0 %vm311_vm0, %v306_v10  ;;  %v343_v32 = vmul.f32 32.0, %v1137_v31  ;;  %vm347_vm1 = vweird.f32 %v1137_v31  ;;  %p1330_p4 = pnand %p1329_p1, %p1513_p3 }
  0x45   : > { %1017 = vmatmul.msk.f32.vlgmr.msra.gmra.mxu2 %vm311_vm0, %v1016_v11  ;;  %398 = vmatpush.msra.mxu1 %v376_v13  ;;  %p1335_p2 = por %p1334_p9, %p1333_p11 }
  0x46   : > { %1015 = vmatmul.msk.f32.vlgmr.msra.gmra.mxu1 %vm311_vm0, %v1014_v14  ;;  %v344_v33 = vsub.f32 1.0, %v343_v32  ;;  %p1331_p8 = pneg %p1330_p4 }
  0x48   : > { %v345_v34 = vmul.f32 %v1137_v31, %v344_v33  ;;  %p1336_p10 = pnand %p1335_p2, %p1331_p8 }
  0x4a   : > { %v346_v35 = vadd.f32 %v1137_v31, %v345_v34 }
  0x4c   : > { %v1572_v36 = vsel %vm347_vm1, %v1137_v31, %v346_v35 }
  0xc1   : > { %v332_v16 = vpop.f32.mrf.mxu0 }
  0xc2   : > { %v335_v17 = vadd.f32 %v332_v16, %v306_v10  ;;  %v1586_v16 = vld [vmem:[#allocation7 + $0x6] ss:$0 sm:$0xff] }
  0xc3   : > { %v400_v20 = vpop.f32.mrf.mxu1 }
  0xc4   : > { %v338_v18 = vadd.f32 %v1129_v15, %v335_v17  ;;  %v403_v22 = vadd.f32 %v1014_v14, %v400_v20 }
  0xc6   : > { %v339_v21 = vsel %vm311_vm0, %v338_v18, 0.0  ;;  %v406_v26 = vadd.f32 %v1131_v19, %v403_v22 }
  0xc7   : > { %340 = vadd.xlane.f32.xlu0 %v339_v21 }
  0xc8   : > { %v458_v24 = vpop.f32.mrf.mxu2  ;;  %v407_v29 = vsel %vm311_vm0, %v406_v26, 0.0 }
  0xc9   : > { %v461_v25 = vadd.f32 %v1016_v11, %v458_v24  ;;  %v1589_v24 = vld [vmem:[#allocation10] sm:$0xf] }
  0xca   : > { %v491_v31 = vperm.slane %v1589_v24, 0  ;;  %v641_v34 = vperm.slane %v1589_v24, 2 }
  0xcb   : > { %v464_v27 = vadd.f32 %v1130_v23, %v461_v25 }
  0xcd   : > { %v465_v28 = vsel %vm311_vm0, %v464_v27, 0.0 }
  0xce   : > { %466 = vadd.xlane.f32.xlu2 %v465_v28 }
  0xcf   : > { %408 = vadd.xlane.f32.xlu0 %v407_v29  ;;  %v545_v29 = vperm.slane %v1589_v24, 1 }
 0x13a   : > { %v341_v37 = vpop.xlane.xlu0 %340 }
 0x13b   : > { %v349_v38 = vmul.f32 %v1572_v36, %v341_v37 }
 0x13d   : > { %v350_v39 = vsub.f32 %v338_v18, %v349_v38 }
 0x13f   : > { %v351_v40 = vmul.f32 %v350_v39, %v350_v39 }
 0x141   : > { %v467_v41 = vpop.xlane.xlu2 %466  ;;  %v352_v43 = vsel %vm311_vm0, %v351_v40, 0.0 }
 0x142   : > { %v468_v42 = vmul.f32 %v467_v41, %v1572_v36  ;;  %353 = vadd.xlane.f32.xlu1 %v352_v43  ;;  %v409_v44 = vpop.xlane.xlu0 %408  ;;  %v1613_v43 = vld [vmem:[#allocation8] sm:$0xff] }
 0x143   : > { %v410_v46 = vmul.f32 %v409_v44, %v1572_v36 }
 0x144   : > { %v469_v45 = vsub.f32 %v464_v27, %v468_v42 }
 0x145   : > { %v411_v47 = vsub.f32 %v406_v26, %v410_v46 }
 0x146   : > { %v470_v48 = vmul.f32 %v469_v45, %v469_v45 }
 0x147   : > { %v412_v50 = vmul.f32 %v411_v47, %v411_v47 }
 0x148   : > { %v471_v49 = vsel %vm311_vm0, %v470_v48, 0.0 }
 0x149   : > { %472 = vadd.xlane.f32.xlu0 %v471_v49  ;;  %v413_v51 = vsel %vm311_vm0, %v412_v50, 0.0 }
 0x14a   : > { %414 = vadd.xlane.f32.xlu1 %v413_v51 }
 0x1b5   : > { %v354_v52 = vpop.xlane.xlu1 %353 }
 0x1b6   : > { %v355_v53 = vmul.f32 %v354_v52, %v1572_v36 }
 0x1b8   : > { %v356_v54 = vadd.f32 1e-05, %v355_v53 }
 0x1ba   : > { %1138 = vrsqrt.f32 %v356_v54  ;;  %vm363_vm3 = vweird.f32 %v356_v54 }
 0x1bc   : > { %v473_v55 = vpop.xlane.xlu0 %472 }
 0x1bd   : > { %v474_v56 = vmul.f32 %v473_v55, %v1572_v36  ;;  %v415_v57 = vpop.xlane.xlu1 %414 }
 0x1be   : > { %v416_v59 = vmul.f32 %v415_v57, %v1572_v36 }
 0x1bf   : > { %v475_v58 = vadd.f32 1e-05, %v474_v56 }
 0x1c0   : > { %v1139_v60 = vpop.eup %1138  ;;  %v417_v61 = vadd.f32 1e-05, %v416_v59 }
 0x1c1   : > { %1140 = vrsqrt.f32 %v475_v58  ;;  %v358_v62 = vmul.f32 %v1139_v60, %v356_v54  ;;  %vm364_vm2 = vweird.f32 %v1139_v60  ;;  %vm482_vm5 = vweird.f32 %v475_v58 }
 0x1c2   : > { %1142 = vrsqrt.f32 %v417_v61  ;;  %vm365_vm4 = vmor %vm363_vm3, %vm364_vm2  ;;  %vm424_vm9 = vweird.f32 %v417_v61 }
 0x1c3   : > { %v359_v63 = vmul.f32 %v1139_v60, %v358_v62 }
 0x1c5   : > { %v360_v0 = vmul.f32 0.5, %v359_v63 }
 0x1c7   : > { %v1141_v1 = vpop.eup %1140  ;;  %v361_v2 = vsub.f32 1.5, %v360_v0 }
 0x1c8   : > { %v477_v3 = vmul.f32 %v1141_v1, %v475_v58  ;;  %v1143_v4 = vpop.eup %1142  ;;  %vm483_vm6 = vweird.f32 %v1141_v1 }
 0x1c9   : > { %v362_v5 = vmul.f32 %v1139_v60, %v361_v2  ;;  %v419_v7 = vmul.f32 %v1143_v4, %v417_v61  ;;  %vm484_vm7 = vmor %vm482_vm5, %vm483_vm6  ;;  %vm425_vm8 = vweird.f32 %v1143_v4 }
 0x1ca   : > { %v478_v6 = vmul.f32 %v1141_v1, %v477_v3  ;;  %vm426_vm10 = vmor %vm424_vm9, %vm425_vm8 }
 0x1cb   : > { %v366_v8 = vsel %vm365_vm4, %v1139_v60, %v362_v5  ;;  %v420_v11 = vmul.f32 %v1143_v4, %v419_v7 }
 0x1cc   : > { %v479_v10 = vmul.f32 0.5, %v478_v6  ;;  %v367_v12 = vmul.f32 %v366_v8, %v350_v39  ;;  %v715_v39 = vperm.slane %v1589_v24, 3 }
 0x1cd   : > { %v421_v14 = vmul.f32 0.5, %v420_v11 }
 0x1ce   : > { %v480_v13 = vsub.f32 1.5, %v479_v10  ;;  %v369_v15 = vmul.f32 %v1583_v9, %v367_v12 }
 0x1cf   : > { %v422_v18 = vsub.f32 1.5, %v421_v14 }
 0x1d0   : > { %v481_v17 = vmul.f32 %v1141_v1, %v480_v13  ;;  %v371_v22 = vadd.f32 %v1586_v16, %v369_v15 }
 0x1d1   : > { %v423_v20 = vmul.f32 %v1143_v4, %v422_v18 }
 0x1d2   : > { %v485_v19 = vsel %vm484_vm7, %v1141_v1, %v481_v17  ;;  %v1595_v30 = vmul.f32 0.17677669, %v371_v22 }
 0x1d3   : > { %v486_v21 = vmul.f32 %v485_v19, %v469_v45  ;;  %v427_v23 = vsel %vm426_vm10, %v1143_v4, %v423_v20 }
 0x1d4   : > { %v428_v25 = vmul.f32 %v427_v23, %v411_v47  ;;  %v492_v35 = vmul.f32 %v491_v31, %v1595_v30  ;;  %v642_v37 = vmul.f32 %v641_v34, %v1595_v30  ;;  %v546_v38 = vmul.f32 %v545_v29, %v1595_v30 }
 0x1d5   : > { %v487_v26 = vmul.f32 %v1583_v9, %v486_v21 }
 0x1d6   : > { %v429_v27 = vmul.f32 %v1583_v9, %v428_v25 }
 0x1d7   : > { %v488_v28 = vadd.f32 %v1586_v16, %v487_v26 }
 0x1d8   : > { %v430_v32 = vadd.f32 %v1586_v16, %v429_v27 }
 0x1d9   : > { %v547_v33 = vmul.f32 %v545_v29, %v488_v28  ;;  %v493_v40 = vmul.f32 %v491_v31, %v488_v28  ;;  %v643_v41 = vmul.f32 %v641_v34, %v488_v28  ;;  %v717_v42 = vmul.f32 %v715_v39, %v488_v28 }
 0x1da   : > { %1018 = vmatpush.xpose.msk.msra.mxu3 %vm311_vm0, %v430_v32  ;;  %1024 = vmatpush.xpose.msk.msrb.mxu2 %vm311_vm0, %v430_v32 }
 0x1db   : > { %613 = vmatpush.msrb.mxu0 %v547_v33  ;;  %636 = vmatpush.msrb.mxu1 %v493_v40 }
 0x1dd   : > { %1027 = vmatpush.xpose.msk.msra.mxu0 %vm311_vm0, %v430_v32  ;;  %1019 = vmatmul.msk.f32.vlgmr.msra.gmra.mxu3 %vm311_vm0, %v492_v35 }
 0x1de   : > { %1020 = vmatpush.xpose.msk.msrb.mxu3 %vm311_vm0, %v430_v32  ;;  %1025 = vmatmul.msk.f32.vlgmr.msrb.gmra.mxu2 %vm311_vm0, %v642_v37 }
 0x1df   : > { %783 = vmatpush.msra.mxu1 %v717_v42 }
 0x1e2   : > { %709 = vmatpush.msra.mxu3 %v643_v41 }
 0x1e5   : > { %1021 = vmatmul.msk.f32.vlgmr.msrb.gmra.mxu3 %vm311_vm0, %v546_v38 }
 0x260   : > { %v517_v44 = vpop.f32.mrf.mxu3 }
 0x261   : > { %v664_v45 = vpop.f32.mrf.mxu2  ;;  %v518_v51 = vadd.f32 %v517_v44, %v1613_v43 }
 0x262   : > { %v665_v46 = vadd.f32 %v664_v45, %v1613_v43 }
 0x263   : > { %v521_v52 = vsel %vm520_vm11, %v518_v51, -inf }
 0x264   : > { %v667_v47 = vsel %vm520_vm11, %v665_v46, -inf }
 0x265   : > { %668 = vmax.xlane.f32.xlu0 %v667_v47 }
 0x268   : > { %v568_v48 = vpop.f32.mrf.mxu3 }
 0x269   : > { %v569_v49 = vadd.f32 %v568_v48, %v1613_v43 }
 0x26b   : > { %v571_v50 = vsel %vm520_vm11, %v569_v49, -inf }
 0x26c   : > { %572 = vmax.xlane.f32.xlu2 %v571_v50 }
 0x274   : > { %522 = vmax.xlane.f32.xlu2 %v521_v52 }
 0x2d8   : > { %v669_v53 = vpop.xlane.xlu0 %668 }
 0x2d9   : > { %v670_v54 = vsub.f32 %v665_v46, %v669_v53  ;;  %v716_v46 = vmul.f32 %v715_v39, %v1595_v30  ;;  %v793_v30 = vld [vmem:[#allocation5 + $0x78] sm:$0xff]  ;;  %v792_v39 = vld [vmem:[#allocation5 + $0x70] sm:$0xff] }
 0x2da   : > { %811 = vmatpush.msra.mxu2 %v793_v30 }
 0x2db   : > { %v671_v55 = vmul.f32 1.442695, %v670_v54 }
 0x2dc   : > { %812 = vmatpush.msra.mxu2 %v792_v39 }
 0x2dd   : > { %1144 = vpow2.f32 %v671_v55 }
 0x2df   : > { %v573_v56 = vpop.xlane.xlu2 %572 }
 0x2e0   : > { %v574_v57 = vsub.f32 %v569_v49, %v573_v56  ;;  %v791_v56 = vld [vmem:[#allocation5 + $0x68] sm:$0xff] }
 0x2e1   : > { %813 = vmatpush.msra.mxu2 %v791_v56 }
 0x2e2   : > { %v575_v58 = vmul.f32 1.442695, %v574_v57 }
 0x2e3   : > { %v1145_v59 = vpop.eup %1144 }
 0x2e4   : > { %1146 = vpow2.f32 %v575_v58  ;;  %v673_v60 = vsel %vm520_vm11, %v1145_v59, 0.0 }
 0x2e5   : > { %674 = vadd.xlane.f32.xlu0 %v673_v60 }
 0x2e7   : > { %v523_v61 = vpop.xlane.xlu2 %522 }
 0x2e8   : > { %v524_v62 = vsub.f32 %v518_v51, %v523_v61 }
 0x2ea   : > { %v1147_v63 = vpop.eup %1146  ;;  %v525_v0 = vmul.f32 1.442695, %v524_v62 }
 0x2eb   : > { %v577_v1 = vsel %vm520_vm11, %v1147_v63, 0.0 }
 0x2ec   : > { %1148 = vpow2.f32 %v525_v0  ;;  %578 = vadd.xlane.f32.xlu1 %v577_v1 }
 0x2f2   : > { %v1149_v2 = vpop.eup %1148 }
 0x2f3   : > { %v527_v3 = vsel %vm520_vm11, %v1149_v2, 0.0 }
 0x2f4   : > { %528 = vadd.xlane.f32.xlu2 %v527_v3 }
 0x358   : > { %v675_v4 = vpop.xlane.xlu0 %674 }
 0x359   : > { %1150 = vrcp.f32 %v675_v4  ;;  %v687_v10 = vand.u32 2147483648, %v675_v4  ;;  %v685_v12 = vand.u32 2147483647, %v675_v4  ;;  %vm681_vm13 = vweird.f32 %v675_v4 }
 0x35b   : > { %v688_v15 = vor.u32 1.1754944e-38, %v687_v10  ;;  %vm686_vm15 = vcmp.eq.f32.partialorder %v685_v12, 8.507059e+37 }
 0x35f   : > { %v1151_v5 = vpop.eup %1150  ;;  %v579_v6 = vpop.xlane.xlu1 %578 }
 0x360   : > { %v677_v7 = vmul.f32 %v1151_v5, %v675_v4  ;;  %1152 = vrcp.f32 %v579_v6  ;;  %vm682_vm12 = vweird.f32 %v1151_v5  ;;  %v591_v22 = vand.u32 2147483648, %v579_v6  ;;  %v790_v4 = vld [vmem:[#allocation5 + $0x60] sm:$0xff] }
 0x361   : > { %vm683_vm14 = vmor %vm681_vm13, %vm682_vm12  ;;  %v589_v26 = vand.u32 2147483647, %v579_v6  ;;  %vm585_vm2 = vweird.f32 %v579_v6  ;;  %814 = vmatpush.msra.mxu2 %v790_v4 }
 0x362   : > { %v678_v8 = vsub.f32 1.0, %v677_v7  ;;  %v592_v29 = vor.u32 1.1754944e-38, %v591_v22 }
 0x363   : > { %vm590_vm4 = vcmp.eq.f32.partialorder %v589_v26, 8.507059e+37 }
 0x364   : > { %v679_v11 = vmul.f32 %v1151_v5, %v678_v8 }
 0x366   : > { %v1153_v13 = vpop.eup %1152  ;;  %v680_v14 = vadd.f32 %v1151_v5, %v679_v11 }
 0x367   : > { %v581_v17 = vmul.f32 %v1153_v13, %v579_v6  ;;  %v529_v18 = vpop.xlane.xlu2 %528  ;;  %vm586_vm1 = vweird.f32 %v1153_v13  ;;  %v823_v6 = vld [vmem:[#allocation5 + $0x90] sm:$0xff] }
 0x368   : > { %v684_v19 = vsel %vm683_vm14, %v1151_v5, %v680_v14  ;;  %1154 = vrcp.f32 %v529_v18  ;;  %vm587_vm3 = vmor %vm585_vm2, %vm586_vm1  ;;  %v541_v37 = vand.u32 2147483648, %v529_v18  ;;  %v539_v40 = vand.u32 2147483647, %v529_v18  ;;  %v824_v5 = vld [vmem:[#allocation5 + $0x98] sm:$0xff]  ;;  %v822_v14 = vld [vmem:[#allocation5 + $0x88] sm:$0xff] }
 0x369   : > { %v689_v20 = vsel %vm686_vm15, %v688_v15, %v684_v19  ;;  %v582_v21 = vsub.f32 1.0, %v581_v17  ;;  %vm535_vm6 = vweird.f32 %v529_v18  ;;  %842 = vmatpush.msrb.mxu3 %v824_v5  ;;  %v821_v15 = vld [vmem:[#allocation5 + $0x80] sm:$0xff] }
 0x36a   : > { %v690_v23 = vmul.f32 %v1145_v59, %v689_v20  ;;  %v542_v42 = vor.u32 1.1754944e-38, %v541_v37  ;;  %vm540_vm8 = vcmp.eq.f32.partialorder %v539_v40, 8.507059e+37  ;;  %v1134_v17 = vld [vmem:[#allocation7 + $0x3] ss:$0 sm:$0xff] }
 0x36b   : > { %v583_v25 = vmul.f32 %v1153_v13, %v582_v21  ;;  %843 = vmatpush.msrb.mxu3 %v823_v6  ;;  %v1135_v21 = vld [vmem:[#allocation7 + $0x4] ss:$0 sm:$0xff] }
 0x36c   : > { %1026 = vmatmul.msk.f32.vlgmr.msra.gmra.mxu3 %vm520_vm11, %v690_v23 }
 0x36d   : > { %v584_v27 = vadd.f32 %v1153_v13, %v583_v25  ;;  %844 = vmatpush.msrb.mxu3 %v822_v14 }
 0x36e   : > { %v1155_v28 = vpop.eup %1154 }
 0x36f   : > { %v531_v31 = vmul.f32 %v1155_v28, %v529_v18  ;;  %v588_v32 = vsel %vm587_vm3, %v1153_v13, %v584_v27  ;;  %vm536_vm5 = vweird.f32 %v1155_v28  ;;  %845 = vmatpush.msrb.mxu3 %v821_v15 }
 0x370   : > { %v593_v33 = vsel %vm590_vm4, %v592_v29, %v588_v32  ;;  %vm537_vm7 = vmor %vm535_vm6, %vm536_vm5 }
 0x371   : > { %v532_v34 = vsub.f32 1.0, %v531_v31  ;;  %v594_v35 = vmul.f32 %v1147_v63, %v593_v33 }
 0x373   : > { %v533_v38 = vmul.f32 %v1155_v28, %v532_v34  ;;  %1022 = vmatmul.msk.f32.vlgmr.msrb.gmra.mxu0 %vm520_vm11, %v594_v35 }
 0x375   : > { %v534_v41 = vadd.f32 %v1155_v28, %v533_v38 }
 0x377   : > { %v538_v44 = vsel %vm537_vm7, %v1155_v28, %v534_v41 }
 0x378   : > { %v543_v45 = vsel %vm540_vm8, %v542_v42, %v538_v44 }
 0x379   : > { %v544_v47 = vmul.f32 %v1149_v2, %v543_v45 }
 0x37b   : > { %1023 = vmatmul.msk.f32.vlgmr.msrb.gmra.mxu1 %vm520_vm11, %v544_v47  ;;  %1028 = vmatmul.msk.f32.vlgmr.msra.gmra.mxu0 %vm311_vm0, %v716_v46 }
 0x3ef   : > { %v711_v10 = vpop.f32.mrf.mxu3 }
 0x3f0   : > { %v615_v48 = vpop.f32.mrf.mxu0 }
 0x3f8   : > { %v738_v49 = vpop.f32.mrf.mxu0  ;;  %v638_v7 = vpop.f32.mrf.mxu1 }
 0x3f9   : > { %v739_v50 = vadd.f32 %v738_v49, %v1613_v43  ;;  %v639_v8 = vadd.f32 %v638_v7, %v615_v48 }
 0x3fb   : > { %v741_v51 = vsel %vm520_vm11, %v739_v50, -inf  ;;  %v714_v11 = vadd.f32 %v711_v10, %v639_v8 }
 0x3fc   : > { %742 = vmax.xlane.f32.xlu1 %v741_v51 }
 0x46f   : > { %v743_v52 = vpop.xlane.xlu1 %742 }
 0x470   : > { %v744_v53 = vsub.f32 %v739_v50, %v743_v52 }
 0x472   : > { %v745_v54 = vmul.f32 1.442695, %v744_v53 }
 0x474   : > { %1156 = vpow2.f32 %v745_v54 }
 0x47a   : > { %v1157_v55 = vpop.eup %1156 }
 0x47b   : > { %v747_v24 = vsel %vm520_vm11, %v1157_v55, 0.0 }
 0x47c   : > { %748 = vadd.xlane.f32.xlu1 %v747_v24 }
 0x4ef   : > { %v749_v57 = vpop.xlane.xlu1 %748 }
 0x4f0   : > { %1158 = vrcp.f32 %v749_v57  ;;  %v761_v60 = vand.u32 2147483648, %v749_v57  ;;  %v759_v62 = vand.u32 2147483647, %v749_v57  ;;  %vm755_vm10 = vweird.f32 %v749_v57 }
 0x4f2   : > { %v762_v0 = vor.u32 1.1754944e-38, %v761_v60  ;;  %vm760_vm13 = vcmp.eq.f32.partialorder %v759_v62, 8.507059e+37 }
 0x4f6   : > { %v1159_v43 = vpop.eup %1158 }
 0x4f7   : > { %v751_v58 = vmul.f32 %v1159_v43, %v749_v57  ;;  %vm756_vm9 = vweird.f32 %v1159_v43 }
 0x4f8   : > { %vm757_vm12 = vmor %vm755_vm10, %vm756_vm9 }
 0x4f9   : > { %v752_v59 = vsub.f32 1.0, %v751_v58 }
 0x4fb   : > { %v753_v61 = vmul.f32 %v1159_v43, %v752_v59 }
 0x4fd   : > { %v754_v63 = vadd.f32 %v1159_v43, %v753_v61 }
 0x4ff   : > { %v758_v1 = vsel %vm757_vm12, %v1159_v43, %v754_v63 }
 0x500   : > { %v763_v2 = vsel %vm760_vm13, %v762_v0, %v758_v1 }
 0x501   : > { %v764_v3 = vmul.f32 %v1157_v55, %v763_v2 }
 0x503   : > { %1029 = vmatmul.msk.f32.vlgmr.msra.gmra.mxu1 %vm520_vm11, %v764_v3 }
 0x580   : > { %v785_v12 = vpop.f32.mrf.mxu1 }
 0x581   : > { %v788_v13 = vadd.f32 %v785_v12, %v714_v11 }
 0x583   : > { %1030 = vmatmul.msk.f32.vlgmr.msra.gmra.mxu2 %vm311_vm0, %v788_v13 }
 0x606   : > { %v816_v18 = vpop.f32.mrf.mxu2 }
 0x607   : > { %v817_v19 = vadd.f32 %v1134_v17, %v816_v18 }
 0x609   : > { %v819_v20 = vmax.f32 %v817_v19, 0.0 }
 0x60b   : > { %1031 = vmatmul.msk.f32.vlgmr.msrb.gmra.mxu3 %vm311_vm0, %v819_v20 }
 0x68e   : > { %v847_v22 = vpop.f32.mrf.mxu3 }
 0x68f   : > { %v848_v23 = vadd.f32 %v1135_v21, %v847_v22 }
 0x691   : > { %v850_v25 = vsel %vm311_vm0, %v848_v23, 0.0 }
 0x692   : > { %851 = vadd.xlane.f32.xlu2 %v850_v25 }
 0x705   : > { %v852_v26 = vpop.xlane.xlu2 %851 }
 0x706   : > { %v853_v27 = vmul.f32 %v852_v26, %v1572_v36 }
 0x708   : > { %v854_v28 = vsub.f32 %v848_v23, %v853_v27 }
 0x70a   : > { %v855_v29 = vmul.f32 %v854_v28, %v854_v28 }
 0x70c   : > { %v856_v31 = vsel %vm311_vm0, %v855_v29, 0.0 }
 0x70d   : > { %857 = vadd.xlane.f32.xlu0 %v856_v31 }
 0x780   : > { %v858_v32 = vpop.xlane.xlu0 %857 }
 0x781   : > { %v859_v33 = vmul.f32 %v858_v32, %v1572_v36 }
 0x783   : > { %v860_v34 = vadd.f32 1e-05, %v859_v33 }
 0x785   : > { %1160 = vrsqrt.f32 %v860_v34  ;;  %vm867_vm14 = vweird.f32 %v860_v34 }
 0x78b   : > { %v1161_v35 = vpop.eup %1160 }
 0x78c   : > { %v862_v37 = vmul.f32 %v1161_v35, %v860_v34  ;;  %vm868_vm11 = vweird.f32 %v1161_v35 }
 0x78d   : > { %vm869_vm15 = vmor %vm867_vm14, %vm868_vm11 }
 0x78e   : > { %v863_v38 = vmul.f32 %v1161_v35, %v862_v37 }
 0x790   : > { %v864_v40 = vmul.f32 0.5, %v863_v38 }
 0x792   : > { %v865_v41 = vsub.f32 1.5, %v864_v40 }
 0x794   : > { %v866_v42 = vmul.f32 %v1161_v35, %v865_v41 }
 0x796   : > { %v870_v36 = vsel %vm869_vm15, %v1161_v35, %v866_v42 }
 0x797   : > { %v871_v44 = vmul.f32 %v870_v36, %v854_v28 }
 0x799   : > { %v872_v45 = vmul.f32 %v1583_v9, %v871_v44 }
 0x79b   : > { %v873_v46 = vadd.f32 %v1586_v16, %v872_v45 }
 0x79d   : > { %874 = vst.msk [vmem:[%s303_s10] sm:$0xff] %vm311_vm0, %v873_v46 }
 0x79e   : > { %1339 = shalt.err (!%p1336_p10)
}
 0x79f   : > { %1056 = dma.vmem_to_hbm [thread:$0]  (%p1513_p3), %s889_s13, 128, %s891_s26, %s876_s22  }
 0x7a0 PF: > { %s902_s1 = sand.u32 1, %s1374_s18   ;;  %p1696_p12 = scmp.ge.s32.totalorder %s1386_s21, 2 }
 0x7a1   : > { %s903_s6 = scalar_lea.sflag [#allocation4], %s902_s1 }
 0x7a2   : > { %p1076_p13 = pnand %p1696_p12, %p1461_p6 }
 0x7a4   : > { %p1077_p0 = pneg %p1076_p13 }
 0x7a6   : > { %1369 = dma.done.wait (%p1077_p0), %s903_s6, 128  }
 0x7a7   : > { %1371 = vsyncadd (%p1077_p0), %s903_s6, 4294967168  ;;  %p20_p5 = scmp.ge.s32.totalorder %s1503_s9, 4   ;;  %s1697_s18 = smov %s1378_s19 }
 0x7a8   : > { %s1698_s19 = smov %s1382_s20  ;;  %s1699_s20 = smov %s1519_s15 }
 0x7a9   : > { %s1700_s21 = smov %s1503_s9  ;;  %22 = sbr.rel (!%p20_p5) target bundleno = 9 (0x9), region = 107 }
 0x7ae   :  { %909 = vsyncpa [#allocation3], 1 }
 0x7af   :  { %911 = vsyncpa [#allocation3 + $0x1], 1 }
 0x7b0   :  { %912 = vsyncpa [#allocation6], 1 }
 0x7b1   :  { %913 = vsyncpa [#allocation9], 1 }
 0x7b2   :  { %914 = vsyncpa [#allocation4], 1 }
 0x7b3   :  { %916 = vsyncpa [#allocation4 + $0x1], 1 }

</bundles_post_ra>
